<compile_context>
chip_gen: v5e
topology: v5e:2x2
jax: 0.10.0
libtpu: 0.0.40
codegen_flags: <defaults>
</compile_context>

<pallas_src>
import jax
import jax.numpy as jnp
from jax.experimental import pallas as pl
from jax.experimental.pallas import tpu as pltpu

HIDDEN1_UNITS = 400
HIDDEN2_UNITS = 400

_HID_PAD = 512   # 400 padded up to a lane multiple
_OUT_PAD = 128   # action_size padded up to one full lane group


def _round_up(x, m):
    return (x + m - 1) // m * m


def _critic_kernel(s_ref, a_ref, w1s_ref, w1a_ref, b1_ref,
                   w2_ref, b2_ref, w3_ref, b3_ref, o_ref):
    # Layer 1: split matmul (no concat needed), bf16 operands, f32 accumulate.
    s_bf = s_ref[...].astype(jnp.bfloat16)
    a_bf = a_ref[...].astype(jnp.bfloat16)
    h1 = jnp.dot(s_bf, w1s_ref[...], preferred_element_type=jnp.float32)
    h1 = h1 + jnp.dot(a_bf, w1a_ref[...], preferred_element_type=jnp.float32)
    h1 = jnp.maximum(h1 + b1_ref[...], 0.0)                 # f32 epilogue

    # Layer 2: Linear + ReLU.
    h2 = jnp.dot(h1.astype(jnp.bfloat16), w2_ref[...],
                 preferred_element_type=jnp.float32)
    h2 = jnp.maximum(h2 + b2_ref[...], 0.0)

    # Layer 3: Linear (no activation), lane-dense (padded) output store.
    out = jnp.dot(h2.astype(jnp.bfloat16), w3_ref[...],
                  preferred_element_type=jnp.float32)
    o_ref[...] = (out + b3_ref[...]).astype(o_ref.dtype)


def critic_forward(s, a, params, *, tile_b=256):
    """s: (B, state_size), a: (B, action_size). Returns (B, action_size)."""
    w1s = params["w1s"]; w1a = params["w1a"]; b1 = params["b1"]
    w2 = params["w2"];   b2 = params["b2"]
    w3 = params["w3"];   b3 = params["b3"]
    action_size = params["action_size"]

    B = s.shape[0]
    state_size = s.shape[1]

    # Batch tiling: big tiles for throughput, but don't over-pad tiny batches.
    tile_b = min(tile_b, _round_up(B, 8))
    b_pad = _round_up(B, tile_b)
    if b_pad != B:
        s = jnp.pad(s, ((0, b_pad - B), (0, 0)))
        a = jnp.pad(a, ((0, b_pad - B), (0, 0)))
    s = s.astype(jnp.float32)
    a = a.astype(jnp.float32)

    grid = (b_pad // tile_b,)

    def resident(shape):
        # Same block index every grid step -> stays VMEM-resident.
        return pl.BlockSpec(shape, lambda i: (0, 0))

    out_padded = pl.pallas_call(
        _critic_kernel,
        out_shape=jax.ShapeDtypeStruct((b_pad, _OUT_PAD), jnp.float32),
        grid=grid,
        in_specs=[
            pl.BlockSpec((tile_b, state_size), lambda i: (i, 0)),   # s tile
            pl.BlockSpec((tile_b, action_size), lambda i: (i, 0)),  # a tile
            resident(w1s.shape), resident(w1a.shape), resident(b1.shape),
            resident(w2.shape), resident(b2.shape),
            resident(w3.shape), resident(b3.shape),
        ],
        out_specs=pl.BlockSpec((tile_b, _OUT_PAD), lambda i: (i, 0)),
        compiler_params=pltpu.CompilerParams(
            dimension_semantics=("parallel",),
            vmem_limit_bytes=32 << 20,
        ),
    )(s, a, w1s, w1a, b1, w2, b2, w3, b3)

    return out_padded[:B, :action_size]


def init_params(key, state_size, action_size):
    """PyTorch nn.Linear default init U(-1/sqrt(fan_in), 1/sqrt(fan_in)).

    Weights stored as (in, out), zero-padded to lane-friendly shapes and cast
    to bf16 for the MXU; biases stay f32. W1 is pre-split into state/action
    row blocks. The padding is inert (extra rows/cols are exactly zero).
    """
    def uniform(k, shape, fan_in):
        bound = 1.0 / jnp.sqrt(jnp.float32(fan_in))
        return jax.random.uniform(k, shape, jnp.float32, -bound, bound)

    fan1 = state_size + action_size
    key, k1w, k1b, k2w, k2b, k3w, k3b = jax.random.split(key, 7)

    # Layer 1: (state+action, 400) -> pad cols to 512, split rows.
    w1 = uniform(k1w, (fan1, HIDDEN1_UNITS), fan1)
    b1 = uniform(k1b, (1, HIDDEN1_UNITS), fan1)
    w1_pad = jnp.pad(w1, ((0, 0), (0, _HID_PAD - HIDDEN1_UNITS)))
    b1_pad = jnp.pad(b1, ((0, 0), (0, _HID_PAD - HIDDEN1_UNITS)))
    w1s = w1_pad[:state_size].astype(jnp.bfloat16)
    w1a = w1_pad[state_size:].astype(jnp.bfloat16)

    # Layer 2: (400, 400) -> pad to (512, 512).
    w2 = uniform(k2w, (HIDDEN1_UNITS, HIDDEN2_UNITS), HIDDEN1_UNITS)
    b2 = uniform(k2b, (1, HIDDEN2_UNITS), HIDDEN1_UNITS)
    w2_pad = jnp.pad(w2, ((0, _HID_PAD - HIDDEN1_UNITS),
                          (0, _HID_PAD - HIDDEN2_UNITS))).astype(jnp.bfloat16)
    b2_pad = jnp.pad(b2, ((0, 0), (0, _HID_PAD - HIDDEN2_UNITS)))

    # Layer 3: (400, action) -> pad to (512, 128).
    w3 = uniform(k3w, (HIDDEN2_UNITS, action_size), HIDDEN2_UNITS)
    b3 = uniform(k3b, (1, action_size), HIDDEN2_UNITS)
    w3_pad = jnp.pad(w3, ((0, _HID_PAD - HIDDEN2_UNITS),
                          (0, _OUT_PAD - action_size))).astype(jnp.bfloat16)
    b3_pad = jnp.pad(b3, ((0, 0), (0, _OUT_PAD - action_size)))

    return {
        "w1s": w1s, "w1a": w1a, "b1": b1_pad,
        "w2": w2_pad, "b2": b2_pad,
        "w3": w3_pad, "b3": b3_pad,
        "action_size": action_size,
    }


def critic_ref(s, a, params):
    """Pure-JAX f32 reference using the same (bf16-stored) weights."""
    w1 = jnp.concatenate([params["w1s"], params["w1a"]], axis=0).astype(jnp.float32)
    w2 = params["w2"].astype(jnp.float32)
    w3 = params["w3"].astype(jnp.float32)
    x = jnp.concatenate([s, a], axis=1).astype(jnp.float32)
    h1 = jnp.maximum(x @ w1 + params["b1"], 0.0)
    h2 = jnp.maximum(h1 @ w2 + params["b2"], 0.0)
    out = h2 @ w3 + params["b3"]
    return out[:, : params["action_size"]]


if __name__ == "__main__":
    batch = 2
    state_size = 16
    action_size = 4

    key = jax.random.PRNGKey(0)
    key, ks, ka, kp = jax.random.split(key, 4)
    s = jax.random.normal(ks, (batch, state_size), jnp.float32)
    a = jax.random.normal(ka, (batch, action_size), jnp.float32)
    params = init_params(kp, state_size, action_size)

    out = critic_forward(s, a, params)
    out = jax.block_until_ready(out)

    ref = critic_ref(s, a, params)
    assert out.shape == (batch, action_size), out.shape
    # bf16 matmul operands with f32 accumulation: allow ~1e-2 drift.
    assert jnp.allclose(out, ref, atol=5e-2, rtol=5e-2), (out, ref)

    print("KERNEL_OK")
</pallas_src>

<mosaic_0001>
module attributes {stable_mosaic.version = 11 : i64} {
  func.func @_critic_kernel(%arg0: i32, %arg1: memref<8x16xf32, #tpu.memory_space<vmem>>, %arg2: memref<8x4xf32, #tpu.memory_space<vmem>>, %arg3: memref<16x512xbf16, #tpu.memory_space<vmem>>, %arg4: memref<4x512xbf16, #tpu.memory_space<vmem>>, %arg5: memref<1x512xf32, #tpu.memory_space<vmem>>, %arg6: memref<512x512xbf16, #tpu.memory_space<vmem>>, %arg7: memref<1x512xf32, #tpu.memory_space<vmem>>, %arg8: memref<512x128xbf16, #tpu.memory_space<vmem>>, %arg9: memref<1x128xf32, #tpu.memory_space<vmem>>, %arg10: memref<8x128xf32, #tpu.memory_space<vmem>>) attributes {dimension_semantics = [#tpu.dimension_semantics<parallel>], iteration_bounds = array<i64: 1>, scalar_prefetch = 0 : i64, scratch_operands = 0 : i64, tpu.core_type = #tpu.core_type<tc>, window_params = [{transform_indices = @transform_0, window_bounds = array<i64: 8, 16>}, {transform_indices = @transform_1, window_bounds = array<i64: 8, 4>}, {pipeline_mode = #tpu.pipeline_mode<synchronous>, transform_indices = @transform_2, window_bounds = array<i64: 16, 512>}, {pipeline_mode = #tpu.pipeline_mode<synchronous>, transform_indices = @transform_3, window_bounds = array<i64: 4, 512>}, {pipeline_mode = #tpu.pipeline_mode<synchronous>, transform_indices = @transform_4, window_bounds = array<i64: 1, 512>}, {pipeline_mode = #tpu.pipeline_mode<synchronous>, transform_indices = @transform_5, window_bounds = array<i64: 512, 512>}, {pipeline_mode = #tpu.pipeline_mode<synchronous>, transform_indices = @transform_6, window_bounds = array<i64: 1, 512>}, {pipeline_mode = #tpu.pipeline_mode<synchronous>, transform_indices = @transform_7, window_bounds = array<i64: 512, 128>}, {pipeline_mode = #tpu.pipeline_mode<synchronous>, transform_indices = @transform_8, window_bounds = array<i64: 1, 128>}, {transform_indices = @transform_9, window_bounds = array<i64: 8, 128>}]} {
    %c0 = arith.constant 0 : index
    %c0_0 = arith.constant 0 : index
    %0 = vector.load %arg1[%c0, %c0_0] : memref<8x16xf32, #tpu.memory_space<vmem>>, vector<8x16xf32>
    %1 = arith.truncf %0 : vector<8x16xf32> to vector<8x16xbf16>
    %c0_1 = arith.constant 0 : index
    %c0_2 = arith.constant 0 : index
    %2 = vector.load %arg2[%c0_1, %c0_2] : memref<8x4xf32, #tpu.memory_space<vmem>>, vector<8x4xf32>
    %3 = arith.truncf %2 : vector<8x4xf32> to vector<8x4xbf16>
    %c0_3 = arith.constant 0 : index
    %c0_4 = arith.constant 0 : index
    %4 = vector.load %arg3[%c0_3, %c0_4] : memref<16x512xbf16, #tpu.memory_space<vmem>>, vector<16x512xbf16>
    %cst = arith.constant dense<0.000000e+00> : vector<8x512xf32>
    %5 = tpu.matmul %1, %4, %cst {dimension_numbers = #tpu.dot_dimension_numbers<[1], [0], [0], [1], [0, 0, 1, 1], [], []>} : vector<8x16xbf16>, vector<16x512xbf16>, vector<8x512xf32> -> vector<8x512xf32>
    %c0_5 = arith.constant 0 : index
    %c0_6 = arith.constant 0 : index
    %6 = vector.load %arg4[%c0_5, %c0_6] : memref<4x512xbf16, #tpu.memory_space<vmem>>, vector<4x512xbf16>
    %cst_7 = arith.constant dense<0.000000e+00> : vector<8x512xf32>
    %7 = tpu.matmul %3, %6, %cst_7 {dimension_numbers = #tpu.dot_dimension_numbers<[1], [0], [0], [1], [0, 0, 1, 1], [], []>} : vector<8x4xbf16>, vector<4x512xbf16>, vector<8x512xf32> -> vector<8x512xf32>
    %8 = arith.addf %5, %7 : vector<8x512xf32>
    %c0_8 = arith.constant 0 : index
    %c0_9 = arith.constant 0 : index
    %9 = vector.load %arg5[%c0_8, %c0_9] : memref<1x512xf32, #tpu.memory_space<vmem>>, vector<1x512xf32>
    %10 = vector.broadcast %9 : vector<1x512xf32> to vector<8x512xf32>
    %11 = arith.addf %8, %10 : vector<8x512xf32>
    %cst_10 = arith.constant 0.000000e+00 : f32
    %12 = vector.broadcast %cst_10 : f32 to vector<8x512xf32>
    %13 = arith.maximumf %11, %12 : vector<8x512xf32>
    %14 = arith.truncf %13 : vector<8x512xf32> to vector<8x512xbf16>
    %c0_11 = arith.constant 0 : index
    %c0_12 = arith.constant 0 : index
    %15 = vector.load %arg6[%c0_11, %c0_12] : memref<512x512xbf16, #tpu.memory_space<vmem>>, vector<512x512xbf16>
    %cst_13 = arith.constant dense<0.000000e+00> : vector<8x512xf32>
    %16 = tpu.matmul %14, %15, %cst_13 {dimension_numbers = #tpu.dot_dimension_numbers<[1], [0], [0], [1], [0, 0, 1, 1], [], []>} : vector<8x512xbf16>, vector<512x512xbf16>, vector<8x512xf32> -> vector<8x512xf32>
    %c0_14 = arith.constant 0 : index
    %c0_15 = arith.constant 0 : index
    %17 = vector.load %arg7[%c0_14, %c0_15] : memref<1x512xf32, #tpu.memory_space<vmem>>, vector<1x512xf32>
    %18 = vector.broadcast %17 : vector<1x512xf32> to vector<8x512xf32>
    %19 = arith.addf %16, %18 : vector<8x512xf32>
    %cst_16 = arith.constant 0.000000e+00 : f32
    %20 = vector.broadcast %cst_16 : f32 to vector<8x512xf32>
    %21 = arith.maximumf %19, %20 : vector<8x512xf32>
    %22 = arith.truncf %21 : vector<8x512xf32> to vector<8x512xbf16>
    %c0_17 = arith.constant 0 : index
    %c0_18 = arith.constant 0 : index
    %23 = vector.load %arg8[%c0_17, %c0_18] : memref<512x128xbf16, #tpu.memory_space<vmem>>, vector<512x128xbf16>
    %cst_19 = arith.constant dense<0.000000e+00> : vector<8x128xf32>
    %24 = tpu.matmul %22, %23, %cst_19 {dimension_numbers = #tpu.dot_dimension_numbers<[1], [0], [0], [1], [0, 0, 1, 1], [], []>} : vector<8x512xbf16>, vector<512x128xbf16>, vector<8x128xf32> -> vector<8x128xf32>
    %c0_20 = arith.constant 0 : index
    %c0_21 = arith.constant 0 : index
    %25 = vector.load %arg9[%c0_20, %c0_21] : memref<1x128xf32, #tpu.memory_space<vmem>>, vector<1x128xf32>
    %26 = vector.broadcast %25 : vector<1x128xf32> to vector<8x128xf32>
    %27 = arith.addf %24, %26 : vector<8x128xf32>
    %c0_22 = arith.constant 0 : index
    %c0_23 = arith.constant 0 : index
    %28 = vector.load %arg10[%c0_22, %c0_23] : memref<8x128xf32, #tpu.memory_space<vmem>>, vector<8x128xf32>
    tpu.vector_store %arg10[%c0_22, %c0_23], %27 {strides = array<i32>} : memref<8x128xf32, #tpu.memory_space<vmem>>, vector<8x128xf32>,
    return
  }
  func.func @transform_0(%arg0: i32) -> (i32, i32) {
    %c0_i32 = arith.constant 0 : i32
    %c0_i32_0 = arith.constant 0 : i32
    return %arg0, %c0_i32 : i32, i32
  }
  func.func @transform_1(%arg0: i32) -> (i32, i32) {
    %c0_i32 = arith.constant 0 : i32
    %c0_i32_0 = arith.constant 0 : i32
    return %arg0, %c0_i32 : i32, i32
  }
  func.func @transform_2(%arg0: i32) -> (i32, i32) {
    %c0_i32 = arith.constant 0 : i32
    %c0_i32_0 = arith.constant 0 : i32
    %c0_i32_1 = arith.constant 0 : i32
    return %c0_i32, %c0_i32_0 : i32, i32
  }
  func.func @transform_3(%arg0: i32) -> (i32, i32) {
    %c0_i32 = arith.constant 0 : i32
    %c0_i32_0 = arith.constant 0 : i32
    %c0_i32_1 = arith.constant 0 : i32
    return %c0_i32, %c0_i32_0 : i32, i32
  }
  func.func @transform_4(%arg0: i32) -> (i32, i32) {
    %c0_i32 = arith.constant 0 : i32
    %c0_i32_0 = arith.constant 0 : i32
    %c0_i32_1 = arith.constant 0 : i32
    return %c0_i32, %c0_i32_0 : i32, i32
  }
  func.func @transform_5(%arg0: i32) -> (i32, i32) {
    %c0_i32 = arith.constant 0 : i32
    %c0_i32_0 = arith.constant 0 : i32
    %c0_i32_1 = arith.constant 0 : i32
    return %c0_i32, %c0_i32_0 : i32, i32
  }
  func.func @transform_6(%arg0: i32) -> (i32, i32) {
    %c0_i32 = arith.constant 0 : i32
    %c0_i32_0 = arith.constant 0 : i32
    %c0_i32_1 = arith.constant 0 : i32
    return %c0_i32, %c0_i32_0 : i32, i32
  }
  func.func @transform_7(%arg0: i32) -> (i32, i32) {
    %c0_i32 = arith.constant 0 : i32
    %c0_i32_0 = arith.constant 0 : i32
    %c0_i32_1 = arith.constant 0 : i32
    return %c0_i32, %c0_i32_0 : i32, i32
  }
  func.func @transform_8(%arg0: i32) -> (i32, i32) {
    %c0_i32 = arith.constant 0 : i32
    %c0_i32_0 = arith.constant 0 : i32
    %c0_i32_1 = arith.constant 0 : i32
    return %c0_i32, %c0_i32_0 : i32, i32
  }
  func.func @transform_9(%arg0: i32) -> (i32, i32) {
    %c0_i32 = arith.constant 0 : i32
    %c0_i32_0 = arith.constant 0 : i32
    return %arg0, %c0_i32 : i32, i32
  }
}

</mosaic_0001>

<bundles_post_ra>
// kernel: tpu_custom_call.1
= control target key start
LH: loop header
LB: loop body
LE: loop exit
PB: predicated region body
PF: predicated region fallthrough
CT: control target
= control target key end

     0   :  { %14 = vsyncpa [#allocation3], 0  ;;  %s2696_s0 = inlined_call_operand.vmem [shape: f32[8,16], index: 0, kind: input, shape index: {}]   ;;  %s2697_s1 = inlined_call_operand.vmem [shape: f32[8,4], index: 1, kind: input, shape index: {}]   ;;  %s2698_s2 = inlined_call_operand.hbm [shape: bf16[16,512], index: 2, kind: input, shape index: {}]   ;;  %s2699_s3 = inlined_call_operand.hbm [shape: bf16[4,512], index: 3, kind: input, shape index: {}]   ;;  %s2700_s4 = inlined_call_operand.vmem [shape: f32[1,512], index: 4, kind: input, shape index: {}]   ;;  %s2701_s5 = inlined_call_operand.hbm [shape: bf16[512,512], index: 5, kind: input, shape index: {}]   ;;  %s2702_s6 = inlined_call_operand.vmem [shape: f32[1,512], index: 6, kind: input, shape index: {}]   ;;  %s2703_s7 = inlined_call_operand.hbm [shape: bf16[512,128], index: 7, kind: input, shape index: {}]   ;;  %s2704_s8 = inlined_call_operand.vmem [shape: f32[1,128], index: 8, kind: input, shape index: {}]   ;;  %s2705_s9 = inlined_call_operand.hbm [shape: f32[8,128], index: 9, kind: output, shape index: {}]  }
   0x1   :  { %15 = vsyncpa [#allocation6], 0 }
   0x2   :  { %16 = vsyncpa [#allocation9], 0  ;;  %s40_s11 = sshll.u32 %s2699_s3, 4  ;;  %s41_s11 = int_to_ptr.hbm [resolvable:$true] %s40_s11 }
   0x3   :  { %17 = vsyncpa [#allocation4], 0  ;;  %s2565_s12 = smov [#allocation5]   ;;  %s26_s16 = sshll.u32 %s2698_s2, 4  ;;  %s27_s16 = int_to_ptr.hbm [resolvable:$true] %s26_s16 }
   0x4   :  { %s42_s13 = sshll.u32 %s2565_s12, 4  ;;  %s2566_s17 = smov [#allocation2]   ;;  %s43_s13 = int_to_ptr.vmem [resolvable:$true] %s42_s13 }
   0x5   :  { %45 = dma.hbm_to_vmem [thread:$0]  %s41_s11, 128, %s43_s13, [#allocation6]  }
   0x6   :  { %s28_s18 = sshll.u32 %s2566_s17, 4  ;;  %s2567_s19 = smov 256   ;;  %s29_s18 = int_to_ptr.vmem [resolvable:$true] %s28_s18 }
   0x7   :  { %s2568_s20 = smov 16   ;;  %s52_s3 = sshll.u32 %s2701_s5, 4  ;;  %s53_s3 = int_to_ptr.hbm [resolvable:$true] %s52_s3 }
   0x8   :  { %34 = dma.hbm_to_vmem [thread:$0]  %s27_s16, 512, %s29_s18, [#allocation3], %s2567_s19, %s2567_s19, %s2568_s20  }
   0x9   :  { %s2569_s23 = smov [#allocation7]   ;;  %s67_s2 = sshll.u32 %s2703_s7, 4  ;;  %s68_s2 = int_to_ptr.hbm [resolvable:$true] %s67_s2 }
   0xa   :  { %s54_s24 = sshll.u32 %s2569_s23, 4  ;;  %s2570_s27 = smov [#allocation8]   ;;  %s55_s24 = int_to_ptr.vmem [resolvable:$true] %s54_s24 }
   0xb   :  { %60 = dma.hbm_to_vmem [thread:$0]  %s53_s3, 16384, %s55_s24, [#allocation6], %s2567_s19, %s2567_s19, %s2568_s20  }
   0xc   :  { %s69_s28 = sshll.u32 %s2570_s27, 4  ;;  %s2571_s29 = smov 64   ;;  %s70_s28 = int_to_ptr.vmem [resolvable:$true] %s69_s28 }
   0xd   :  { %s2572_s30 = smov 4  }
   0xe   :  { %75 = dma.hbm_to_vmem [thread:$0]  %s68_s2, 4096, %s70_s28, [#allocation9], %s2571_s29, %s2571_s29, %s2572_s30  }
   0xf   :  { %2557 = dma.done.wait [#allocation3], 512  }
  0x10   :  { %2558 = vsyncadd [#allocation3], 4294966784 }
  0x11   :  { %2559 = dma.done.wait [#allocation6], 16512  }
  0x12   :  { %2560 = vsyncadd [#allocation6], 4294950784 }
  0x13   :  { %2561 = dma.done.wait [#allocation9], 4096  }
  0x14   :  { %2562 = vsyncadd [#allocation9], 4294963200  ;;  %v103_v0 = vld [vmem:[#allocation5] sm:$0xff]  ;;  %v2265_v2 = vld [vmem:[#allocation2 + $0xc] sm:$0xf0]  ;;  %vm114_vm0 = vcmask 1041408  }
  0x15   :  { %105 = vst [vmem:[#allocation1] ss:$4 sm:$0xff] %v103_v0  ;;  %v1605_v1 = vld [vmem:[#allocation2] sm:$0xf]  ;;  %v97_v3 = vld [vmem:[%s2697_s1] sm:$0xff]  ;;  %vm110_vm1 = vcmask 31744  }
  0x16   :  { %v1613_v4 = vld [vmem:[#allocation2 + $0x8] sm:$0xf]  ;;  %v2266_v5 = vld [vmem:[#allocation2 + $0x14] sm:$0xf0]  ;;  %v2263_v6 = vld [vmem:[#allocation2 + $0x4] sm:$0xf]  ;;  %v1606_v9 = vor.u32 %v2265_v2, %v1605_v1  ;;  %v98_v24 = vpack.c.bf16 %v97_v3, %v97_v3 }
  0x17   :  { %v1607_v7 = vld [vmem:[#allocation2 + $0x10] sm:$0xf0]  ;;  %v1737_v8 = vld [vmem:[#allocation7 + $0xe0] sm:$0xf]  ;;  %v2264_v10 = vld [vmem:[#allocation2 + $0xc] sm:$0xf]  ;;  %v1614_v17 = vor.u32 %v2266_v5, %v1613_v4 }
  0x18   :  { %v1615_v11 = vld [vmem:[#allocation2 + $0x18] sm:$0xf0]  ;;  %v2297_v12 = vld [vmem:[#allocation7 + $0xec] sm:$0xf0]  ;;  %v1865_v13 = vld [vmem:[#allocation7 + $0x1e0] sm:$0xf]  ;;  %v1610_v27 = vor.u32 %v2263_v6, %v1607_v7 }
  0x19   :  { %v2329_v14 = vld [vmem:[#allocation7 + $0x1ec] sm:$0xf0]  ;;  %v1993_v18 = vld [vmem:[#allocation7 + $0x2e0] sm:$0xf]  ;;  %v1738_v30 = vor.u32 %v2297_v12, %v1737_v8  ;;  %v1618_v31 = vor.u32 %v2264_v10, %v1615_v11  ;;  %vm195_vm2 = vcmask 130048   ;;  %s2573_s14 = smov [#allocation10]  }
  0x1a   :  { %v2361_v19 = vld [vmem:[#allocation7 + $0x2ec] sm:$0xf0]  ;;  %v2121_v20 = vld [vmem:[#allocation7 + $0x3e0] sm:$0xf]  ;;  %v1866_v32 = vor.u32 %v2329_v14, %v1865_v13  ;;  %s1585_s15 = sshll.u32 %s2573_s14, 4  ;;  %s1587_s18 = sshll.u32 %s2705_s9, 4  ;;  %s1586_s15 = int_to_ptr.vmem [resolvable:$true] %s1585_s15  ;;  %s1588_s18 = int_to_ptr.hbm [resolvable:$true] %s1587_s18 }
  0x1b   :  { %v2393_v28 = vld [vmem:[#allocation7 + $0x3ec] sm:$0xf0]  ;;  %v1721_v33 = vld [vmem:[#allocation7 + $0xc0] sm:$0xf]  ;;  %v1994_v37 = vor.u32 %v2361_v19, %v1993_v18 }
  0x1c   :  { %v106_v15 = vld.sshfl [vmem:[#allocation1] sm:$0xff pattern:$0x73625140]  ;;  %v107_v16 = vld.sshfl [vmem:[#allocation1 + $0x8] sm:$0xff pattern:$0x73625140]  ;;  %v2122_v38 = vor.u32 %v2393_v28, %v2121_v20 }
  0x1d   :  { %v115_v21 = vsel %vm114_vm0, %v106_v15, 0  ;;  %v117_v22 = vsel %vm114_vm0, %v107_v16, 0  ;;  %v108_v23 = vld.sshfl [vmem:[#allocation1 + $0x10] sm:$0xff pattern:$0x73625140]  ;;  %v95_v63 = vld [vmem:[%s2696_s0] sm:$0xff] }
  0x1e   :  { %130 = vmatpush.bf16.msra.mxu0 %v115_v21  ;;  %143 = vmatpush.bf16.msra.mxu1 %v117_v22  ;;  %v119_v25 = vsel %vm114_vm0, %v108_v23, 0  ;;  %v109_v26 = vld.sshfl [vmem:[#allocation1 + $0x18] sm:$0xff pattern:$0x73625140]  ;;  %v2293_v34 = vld [vmem:[#allocation7 + $0xcc] sm:$0xf0]  ;;  %v96_v7 = vpack.c.bf16 %v95_v63, %v95_v63 }
  0x1f   :  { %156 = vmatpush.bf16.msra.mxu2 %v119_v25  ;;  %v121_v29 = vsel %vm114_vm0, %v109_v26, 0  ;;  %v1849_v35 = vld [vmem:[#allocation7 + $0x1c0] sm:$0xf]  ;;  %v2325_v36 = vld [vmem:[#allocation7 + $0x1cc] sm:$0xf0]  ;;  %v1722_v43 = vor.u32 %v2293_v34, %v1721_v33 }
  0x20   :  { %169 = vmatpush.bf16.msra.mxu3 %v121_v29  ;;  %v1977_v39 = vld [vmem:[#allocation7 + $0x2c0] sm:$0xf]  ;;  %v2357_v40 = vld [vmem:[#allocation7 + $0x2cc] sm:$0xf0]  ;;  %v1850_v44 = vor.u32 %v2325_v36, %v1849_v35 }
  0x21   :  { %1599 = vmatmul.msk.bf16.vlgmr.msra.gmra.mxu0 %vm110_vm1, %v98_v24  ;;  %1600 = vmatmul.msk.bf16.vlgmr.msra.gmra.mxu1 %vm110_vm1, %v98_v24  ;;  %v2105_v41 = vld [vmem:[#allocation7 + $0x3c0] sm:$0xf]  ;;  %v2389_v42 = vld [vmem:[#allocation7 + $0x3cc] sm:$0xf0]  ;;  %v1978_v49 = vor.u32 %v2357_v40, %v1977_v39 }
  0x22   :  { %206 = vmatpush.bf16.msrb.mxu0 %v1606_v9  ;;  %1601 = vmatmul.msk.bf16.vlgmr.msra.gmra.mxu2 %vm110_vm1, %v98_v24  ;;  %v1705_v45 = vld [vmem:[#allocation7 + $0xa0] sm:$0xf]  ;;  %v2289_v46 = vld [vmem:[#allocation7 + $0xac] sm:$0xf0]  ;;  %v2106_v50 = vor.u32 %v2389_v42, %v2105_v41 }
  0x23   :  { %232 = vmatpush.bf16.msrb.mxu2 %v1614_v17  ;;  %219 = vmatpush.bf16.msrb.mxu1 %v1610_v27  ;;  %v1833_v47 = vld [vmem:[#allocation7 + $0x1a0] sm:$0xf]  ;;  %v2321_v48 = vld [vmem:[#allocation7 + $0x1ac] sm:$0xf0]  ;;  %v1706_v55 = vor.u32 %v2289_v46, %v1705_v45  ;;  %v2295_v45 = vld [vmem:[#allocation7 + $0xe4] sm:$0xf] }
  0x24   :  { %1602 = vmatmul.msk.bf16.vlgmr.msra.gmra.mxu3 %vm110_vm1, %v98_v24  ;;  %v1961_v51 = vld [vmem:[#allocation7 + $0x2a0] sm:$0xf]  ;;  %v2353_v52 = vld [vmem:[#allocation7 + $0x2ac] sm:$0xf0]  ;;  %v1834_v56 = vor.u32 %v2321_v48, %v1833_v47  ;;  %v1739_v46 = vld [vmem:[#allocation7 + $0xf0] sm:$0xf0] }
  0x25   :  { %245 = vmatpush.bf16.msrb.mxu3 %v1618_v31  ;;  %v2089_v53 = vld [vmem:[#allocation7 + $0x3a0] sm:$0xf]  ;;  %v2385_v54 = vld [vmem:[#allocation7 + $0x3ac] sm:$0xf0]  ;;  %v1962_v61 = vor.u32 %v2353_v52, %v1961_v51  ;;  %v2327_v47 = vld [vmem:[#allocation7 + $0x1e4] sm:$0xf] }
  0x26   :  { %1051 = vmatpush.bf16.msra.mxu0 %v1738_v30  ;;  %v1689_v57 = vld [vmem:[#allocation7 + $0x80] sm:$0xf]  ;;  %v2285_v58 = vld [vmem:[#allocation7 + $0x8c] sm:$0xf0]  ;;  %v2090_v62 = vor.u32 %v2385_v54, %v2089_v53  ;;  %v1867_v48 = vld [vmem:[#allocation7 + $0x1f0] sm:$0xf0]  ;;  %v1742_v54 = vor.u32 %v2295_v45, %v1739_v46 }
  0x27   :  { %1064 = vmatpush.bf16.msra.mxu1 %v1866_v32  ;;  %1077 = vmatpush.bf16.msra.mxu2 %v1994_v37  ;;  %v1817_v59 = vld [vmem:[#allocation7 + $0x180] sm:$0xf]  ;;  %v2317_v60 = vld [vmem:[#allocation7 + $0x18c] sm:$0xf0]  ;;  %v1690_v0 = vor.u32 %v2285_v58, %v1689_v57  ;;  %v2291_v57 = vld [vmem:[#allocation7 + $0xc4] sm:$0xf] }
  0x28   :  { %v2073_v1 = vld [vmem:[#allocation7 + $0x380] sm:$0xf]  ;;  %v2381_v2 = vld [vmem:[#allocation7 + $0x38c] sm:$0xf0]  ;;  %v1818_v3 = vor.u32 %v2317_v60, %v1817_v59  ;;  %v1723_v58 = vld [vmem:[#allocation7 + $0xd0] sm:$0xf0] }
  0x29   :  { %1090 = vmatpush.bf16.msra.mxu3 %v2122_v38  ;;  %v1673_v4 = vld [vmem:[#allocation7 + $0x60] sm:$0xf]  ;;  %v2281_v5 = vld [vmem:[#allocation7 + $0x6c] sm:$0xf0]  ;;  %v2074_v11 = vor.u32 %v2381_v2, %v2073_v1  ;;  %v2323_v59 = vld [vmem:[#allocation7 + $0x1c4] sm:$0xf]  ;;  %v1726_v60 = vor.u32 %v2291_v57, %v1723_v58 }
  0x2a   :  { %1052 = vmatpush.bf16.msra.mxu0 %v1722_v43  ;;  %v1801_v6 = vld [vmem:[#allocation7 + $0x160] sm:$0xf]  ;;  %v2313_v8 = vld [vmem:[#allocation7 + $0x16c] sm:$0xf0]  ;;  %v1674_v12 = vor.u32 %v2281_v5, %v1673_v4  ;;  %v2359_v4 = vld [vmem:[#allocation7 + $0x2e4] sm:$0xf] }
  0x2b   :  { %1065 = vmatpush.bf16.msra.mxu1 %v1850_v44  ;;  %1078 = vmatpush.bf16.msra.mxu2 %v1978_v49  ;;  %v1945_v9 = vld [vmem:[#allocation7 + $0x280] sm:$0xf]  ;;  %v2349_v10 = vld [vmem:[#allocation7 + $0x28c] sm:$0xf0]  ;;  %v1802_v16 = vor.u32 %v2313_v8, %v1801_v6  ;;  %v1995_v6 = vld [vmem:[#allocation7 + $0x2f0] sm:$0xf0] }
  0x2c   :  { %v1657_v13 = vld [vmem:[#allocation7 + $0x40] sm:$0xf]  ;;  %v2377_v15 = vld [vmem:[#allocation7 + $0x36c] sm:$0xf0]  ;;  %v1946_v17 = vor.u32 %v2349_v10, %v1945_v9  ;;  %v2123_v8 = vld [vmem:[#allocation7 + $0x3f0] sm:$0xf0]  ;;  %v1998_v9 = vor.u32 %v2359_v4, %v1995_v6 }
  0x2d   :  { %1091 = vmatpush.bf16.msra.mxu3 %v2106_v50  ;;  %v2057_v14 = vld [vmem:[#allocation7 + $0x360] sm:$0xf]  ;;  %v2277_v18 = vld [vmem:[#allocation7 + $0x4c] sm:$0xf0]  ;;  %v2075_v45 = vld [vmem:[#allocation7 + $0x390] sm:$0xf0] }
  0x2e   :  { %1053 = vmatpush.bf16.msra.mxu0 %v1706_v55  ;;  %v1785_v19 = vld [vmem:[#allocation7 + $0x140] sm:$0xf]  ;;  %v2309_v20 = vld [vmem:[#allocation7 + $0x14c] sm:$0xf0]  ;;  %v2058_v23 = vor.u32 %v2377_v15, %v2057_v14  ;;  %v1658_v24 = vor.u32 %v2277_v18, %v1657_v13  ;;  %v1870_v55 = vor.u32 %v2327_v47, %v1867_v48  ;;  %v2319_v13 = vld [vmem:[#allocation7 + $0x1a4] sm:$0xf] }
  0x2f   :  { %1066 = vmatpush.bf16.msra.mxu1 %v1834_v56  ;;  %1079 = vmatpush.bf16.msra.mxu2 %v1962_v61  ;;  %v1929_v21 = vld [vmem:[#allocation7 + $0x260] sm:$0xf]  ;;  %v2345_v22 = vld [vmem:[#allocation7 + $0x26c] sm:$0xf0]  ;;  %v1786_v27 = vor.u32 %v2309_v20, %v1785_v19  ;;  %v1851_v61 = vld [vmem:[#allocation7 + $0x1d0] sm:$0xf0] }
  0x30   :  { %v2041_v25 = vld [vmem:[#allocation7 + $0x340] sm:$0xf]  ;;  %v2373_v26 = vld [vmem:[#allocation7 + $0x34c] sm:$0xf0]  ;;  %v1930_v28 = vor.u32 %v2345_v22, %v1929_v21  ;;  %v1835_v15 = vld [vmem:[#allocation7 + $0x1b0] sm:$0xf0] }
  0x31   :  { %1092 = vmatpush.bf16.msra.mxu3 %v2090_v62  ;;  %1619 = vmatmul.msk.bf16.vlgmr.msrb.gmra.mxu0 %vm195_vm2, %v96_v7  ;;  %v1641_v29 = vld [vmem:[#allocation7 + $0x20] sm:$0xf]  ;;  %v2273_v30 = vld [vmem:[#allocation7 + $0x2c] sm:$0xf0]  ;;  %v2042_v35 = vor.u32 %v2373_v26, %v2041_v25  ;;  %v1979_v18 = vld [vmem:[#allocation7 + $0x2d0] sm:$0xf0] }
  0x32   :  { %1054 = vmatpush.bf16.msra.mxu0 %v1690_v0  ;;  %1620 = vmatmul.msk.bf16.vlgmr.msrb.gmra.mxu1 %vm195_vm2, %v96_v7  ;;  %v1769_v31 = vld [vmem:[#allocation7 + $0x120] sm:$0xf]  ;;  %v2305_v32 = vld [vmem:[#allocation7 + $0x12c] sm:$0xf0]  ;;  %v1642_v36 = vor.u32 %v2273_v30, %v1641_v29  ;;  %v1854_v0 = vor.u32 %v2323_v59, %v1851_v61  ;;  %v2387_v19 = vld [vmem:[#allocation7 + $0x3c4] sm:$0xf] }
  0x33   :  { %1067 = vmatpush.bf16.msra.mxu1 %v1818_v3  ;;  %1621 = vmatmul.msk.bf16.vlgmr.msrb.gmra.mxu2 %vm195_vm2, %v96_v7  ;;  %v1913_v33 = vld [vmem:[#allocation7 + $0x240] sm:$0xf]  ;;  %v2341_v34 = vld [vmem:[#allocation7 + $0x24c] sm:$0xf0]  ;;  %v1770_v40 = vor.u32 %v2305_v32, %v1769_v31  ;;  %v2107_v21 = vld [vmem:[#allocation7 + $0x3d0] sm:$0xf0] }
  0x34   :  { %1622 = vmatmul.msk.bf16.vlgmr.msrb.gmra.mxu3 %vm195_vm2, %v96_v7  ;;  %1080 = vmatpush.bf16.msra.mxu2 %v1946_v17  ;;  %v1625_v37 = vld [vmem:[#allocation7] sm:$0xf]  ;;  %v2369_v39 = vld [vmem:[#allocation7 + $0x32c] sm:$0xf0]  ;;  %v1914_v41 = vor.u32 %v2341_v34, %v1913_v33  ;;  %v2391_v7 = vld [vmem:[#allocation7 + $0x3e4] sm:$0xf]  ;;  %v2110_v22 = vor.u32 %v2387_v19, %v2107_v21 }
  0x35   :  { %1093 = vmatpush.bf16.msra.mxu3 %v2074_v11  ;;  %v2025_v38 = vld [vmem:[#allocation7 + $0x320] sm:$0xf]  ;;  %v2269_v42 = vld [vmem:[#allocation7 + $0xc] sm:$0xf0]  ;;  %v2126_v10 = vor.u32 %v2391_v7, %v2123_v8  ;;  %v2287_v11 = vld [vmem:[#allocation7 + $0xa4] sm:$0xf] }
  0x36   :  { %1055 = vmatpush.bf16.msra.mxu0 %v1674_v12  ;;  %v1753_v43 = vld [vmem:[#allocation7 + $0x100] sm:$0xf]  ;;  %v2301_v44 = vld [vmem:[#allocation7 + $0x10c] sm:$0xf0]  ;;  %v2026_v51 = vor.u32 %v2369_v39, %v2025_v38  ;;  %v1626_v52 = vor.u32 %v2269_v42, %v1625_v37  ;;  %v1707_v12 = vld [vmem:[#allocation7 + $0xb0] sm:$0xf0] }
  0x37   :  { %1068 = vmatpush.bf16.msra.mxu1 %v1802_v16  ;;  %v1897_v49 = vld [vmem:[#allocation7 + $0x220] sm:$0xf]  ;;  %v2337_v50 = vld [vmem:[#allocation7 + $0x22c] sm:$0xf0]  ;;  %v1754_v53 = vor.u32 %v2301_v44, %v1753_v43  ;;  %v1710_v14 = vor.u32 %v2287_v11, %v1707_v12  ;;  %v1838_v16 = vor.u32 %v2319_v13, %v1835_v15  ;;  %v2355_v17 = vld [vmem:[#allocation7 + $0x2c4] sm:$0xf] }
  0x38   :  { %1081 = vmatpush.bf16.msra.mxu2 %v1930_v28  ;;  %v1898_v56 = vor.u32 %v2337_v50, %v1897_v49  ;;  %v1881_v62 = vld [vmem:[#allocation7 + $0x200] sm:$0xf]  ;;  %v2333_v63 = vld [vmem:[#allocation7 + $0x20c] sm:$0xf0]  ;;  %v1982_v20 = vor.u32 %v2355_v17, %v1979_v18  ;;  %v2315_v25 = vld [vmem:[#allocation7 + $0x184] sm:$0xf] }
  0x39   :  { %1094 = vmatpush.bf16.msra.mxu3 %v2058_v23  ;;  %v1882_v1 = vor.u32 %v2333_v63, %v1881_v62  ;;  %v2009_v2 = vld [vmem:[#allocation7 + $0x300] sm:$0xf]  ;;  %v2365_v3 = vld [vmem:[#allocation7 + $0x30c] sm:$0xf0]  ;;  %v2283_v23 = vld [vmem:[#allocation7 + $0x84] sm:$0xf] }
  0x3a   :  { %1056 = vmatpush.bf16.msra.mxu0 %v1658_v24  ;;  %v2010_v5 = vor.u32 %v2365_v3, %v2009_v2  ;;  %v1691_v24 = vld [vmem:[#allocation7 + $0x90] sm:$0xf0]  ;;  %v2351_v29 = vld [vmem:[#allocation7 + $0x2a4] sm:$0xf] }
  0x3b   :  { %1069 = vmatpush.bf16.msra.mxu1 %v1786_v27  ;;  %v1694_v26 = vor.u32 %v2283_v23, %v1691_v24  ;;  %v1819_v27 = vld [vmem:[#allocation7 + $0x190] sm:$0xf0]  ;;  %v2383_v31 = vld [vmem:[#allocation7 + $0x3a4] sm:$0xf] }
  0x3c   :  { %1082 = vmatpush.bf16.msra.mxu2 %v1914_v41  ;;  %v1822_v28 = vor.u32 %v2315_v25, %v1819_v27  ;;  %v1963_v30 = vld [vmem:[#allocation7 + $0x2b0] sm:$0xf0]  ;;  %v2279_v34 = vld [vmem:[#allocation7 + $0x64] sm:$0xf] }
  0x3d   :  { %1095 = vmatpush.bf16.msra.mxu3 %v2042_v35  ;;  %v1966_v32 = vor.u32 %v2351_v29, %v1963_v30  ;;  %v2091_v33 = vld [vmem:[#allocation7 + $0x3b0] sm:$0xf0]  ;;  %v2311_v38 = vld [vmem:[#allocation7 + $0x164] sm:$0xf] }
  0x3e   :  { %1057 = vmatpush.bf16.msra.mxu0 %v1642_v36  ;;  %v1675_v35 = vld [vmem:[#allocation7 + $0x70] sm:$0xf0]  ;;  %v2094_v36 = vor.u32 %v2383_v31, %v2091_v33  ;;  %v2347_v41 = vld [vmem:[#allocation7 + $0x284] sm:$0xf]  ;;  %v251_v31 = vld [vmem:[%s2700_s4] sm:$0xf] }
  0x3f   :  { %1070 = vmatpush.bf16.msra.mxu1 %v1770_v40  ;;  %v1678_v37 = vor.u32 %v2279_v34, %v1675_v35  ;;  %v1803_v39 = vld [vmem:[#allocation7 + $0x170] sm:$0xf0]  ;;  %v2379_v43 = vld [vmem:[#allocation7 + $0x384] sm:$0xf]  ;;  %v253_v33 = vperm.slane %v251_v31, 0 }
  0x40   :  { %1083 = vmatpush.bf16.msra.mxu2 %v1898_v56  ;;  %v1806_v40 = vor.u32 %v2311_v38, %v1803_v39  ;;  %v1947_v42 = vld [vmem:[#allocation7 + $0x290] sm:$0xf0]  ;;  %v2078_v46 = vor.u32 %v2379_v43, %v2075_v45  ;;  %v2275_v47 = vld [vmem:[#allocation7 + $0x44] sm:$0xf]  ;;  %v2330_v45 = vld [vmem:[#allocation7 + $0x1f4] sm:$0xf0] }
  0x41   :  { %1096 = vmatpush.bf16.msra.mxu3 %v2026_v51  ;;  %v1950_v44 = vor.u32 %v2347_v41, %v1947_v42  ;;  %v1659_v48 = vld [vmem:[#allocation7 + $0x50] sm:$0xf0]  ;;  %v2307_v49 = vld [vmem:[#allocation7 + $0x144] sm:$0xf]  ;;  %v1745_v41 = vld [vmem:[#allocation7 + $0xe8] sm:$0xf] }
  0x42   :  { %1058 = vmatpush.bf16.msra.mxu0 %v1626_v52  ;;  %v1662_v50 = vor.u32 %v2275_v47, %v1659_v48  ;;  %v1787_v51 = vld [vmem:[#allocation7 + $0x150] sm:$0xf0]  ;;  %v2375_v56 = vld [vmem:[#allocation7 + $0x364] sm:$0xf]  ;;  %v2298_v42 = vld [vmem:[#allocation7 + $0xf4] sm:$0xf0] }
  0x43   :  { %1071 = vmatpush.bf16.msra.mxu1 %v1754_v53  ;;  %v1790_v52 = vor.u32 %v2307_v49, %v1787_v51  ;;  %v2343_v53 = vld [vmem:[#allocation7 + $0x264] sm:$0xf]  ;;  %v2059_v57 = vld [vmem:[#allocation7 + $0x370] sm:$0xf0]  ;;  %v255_v48 = vperm.slane %v251_v31, 2  ;;  %v1746_v49 = vor.u32 %v2298_v42, %v1745_v41 }
  0x44   :  { %1084 = vmatpush.bf16.msra.mxu2 %v1882_v1  ;;  %v2062_v58 = vor.u32 %v2375_v56, %v2059_v57  ;;  %v2271_v59 = vld [vmem:[#allocation7 + $0x24] sm:$0xf]  ;;  %v1771_v63 = vld [vmem:[#allocation7 + $0x130] sm:$0xf0]  ;;  %v2314_v41 = vld [vmem:[#allocation7 + $0x174] sm:$0xf0] }
  0x45   :  { %1097 = vmatpush.bf16.msra.mxu3 %v2010_v5  ;;  %v2303_v62 = vld [vmem:[#allocation7 + $0x124] sm:$0xf]  ;;  %v1915_v2 = vld [vmem:[#allocation7 + $0x250] sm:$0xf0] }
  0x46   :  { %1103 = vmatpush.bf16.msrb.mxu0 %v1742_v54  ;;  %v1931_v54 = vld [vmem:[#allocation7 + $0x270] sm:$0xf0]  ;;  %v2339_v1 = vld [vmem:[#allocation7 + $0x244] sm:$0xf] }
  0x47   :  { %1116 = vmatpush.bf16.msrb.mxu1 %v1870_v55  ;;  %v1934_v55 = vor.u32 %v2343_v53, %v1931_v54  ;;  %v2371_v3 = vld [vmem:[#allocation7 + $0x344] sm:$0xf]  ;;  %v1918_v4 = vor.u32 %v2339_v1, %v1915_v2  ;;  %v2043_v5 = vld [vmem:[#allocation7 + $0x350] sm:$0xf0]  ;;  %v1729_v54 = vld [vmem:[#allocation7 + $0xc8] sm:$0xf] }
  0x48   :  { %1129 = vmatpush.bf16.msrb.mxu2 %v1998_v9  ;;  %v2046_v6 = vor.u32 %v2371_v3, %v2043_v5  ;;  %v2267_v7 = vld [vmem:[#allocation7 + $0x4] sm:$0xf]  ;;  %v1627_v8 = vld [vmem:[#allocation7 + $0x10] sm:$0xf0]  ;;  %v2001_v2 = vld [vmem:[#allocation7 + $0x2e8] sm:$0xf] }
  0x49   :  { %1142 = vmatpush.bf16.msrb.mxu3 %v2126_v10  ;;  %v2299_v9 = vld [vmem:[#allocation7 + $0x104] sm:$0xf]  ;;  %v1630_v10 = vor.u32 %v2267_v7, %v1627_v8  ;;  %v1755_v11 = vld [vmem:[#allocation7 + $0x110] sm:$0xf0]  ;;  %v2362_v3 = vld [vmem:[#allocation7 + $0x2f4] sm:$0xf0] }
  0x4a   :  { %1104 = vmatpush.bf16.msrb.mxu0 %v1726_v60  ;;  %v1643_v60 = vld [vmem:[#allocation7 + $0x30] sm:$0xf0]  ;;  %v1758_v12 = vor.u32 %v2299_v9, %v1755_v11  ;;  %v2335_v13 = vld [vmem:[#allocation7 + $0x224] sm:$0xf]  ;;  %v2394_v7 = vld [vmem:[#allocation7 + $0x3f4] sm:$0xf0] }
  0x4b   :  { %1117 = vmatpush.bf16.msrb.mxu1 %v1854_v0  ;;  %v1646_v61 = vor.u32 %v2271_v59, %v1643_v60  ;;  %v1774_v0 = vor.u32 %v2303_v62, %v1771_v63  ;;  %v2027_v17 = vld [vmem:[#allocation7 + $0x330] sm:$0xf0]  ;;  %v2331_v19 = vld [vmem:[#allocation7 + $0x204] sm:$0xf]  ;;  %v1857_v60 = vld [vmem:[#allocation7 + $0x1c8] sm:$0xf] }
  0x4c   :  { %1130 = vmatpush.bf16.msrb.mxu2 %v1982_v20  ;;  %v1883_v20 = vld [vmem:[#allocation7 + $0x210] sm:$0xf0]  ;;  %v1713_v8 = vld [vmem:[#allocation7 + $0xa8] sm:$0xf]  ;;  %v2290_v9 = vld [vmem:[#allocation7 + $0xb4] sm:$0xf0] }
  0x4d   :  { %1143 = vmatpush.bf16.msrb.mxu3 %v2110_v22  ;;  %v1886_v21 = vor.u32 %v2331_v19, %v1883_v20  ;;  %v2363_v22 = vld [vmem:[#allocation7 + $0x304] sm:$0xf]  ;;  %v2011_v23 = vld [vmem:[#allocation7 + $0x310] sm:$0xf0]  ;;  %v1841_v11 = vld [vmem:[#allocation7 + $0x1a8] sm:$0xf] }
  0x4e   :  { %1105 = vmatpush.bf16.msrb.mxu0 %v1710_v14  ;;  %v1899_v14 = vld [vmem:[#allocation7 + $0x230] sm:$0xf0]  ;;  %v2014_v24 = vor.u32 %v2363_v22, %v2011_v23  ;;  %v2358_v19 = vld [vmem:[#allocation7 + $0x2d4] sm:$0xf0]  ;;  %v2113_v20 = vld [vmem:[#allocation7 + $0x3c8] sm:$0xf] }
  0x4f   :  { %1118 = vmatpush.bf16.msrb.mxu1 %v1838_v16  ;;  %v1902_v15 = vor.u32 %v2335_v13, %v1899_v14  ;;  %v2367_v16 = vld [vmem:[#allocation7 + $0x324] sm:$0xf]  ;;  %v2002_v14 = vor.u32 %v2362_v3, %v2001_v2  ;;  %v1777_v2 = vld [vmem:[#allocation7 + $0x128] sm:$0xf]  ;;  %v2306_v3 = vld [vmem:[#allocation7 + $0x134] sm:$0xf0] }
  0x50   :  { %1131 = vmatpush.bf16.msrb.mxu2 %v1966_v32  ;;  %v2030_v18 = vor.u32 %v2367_v16, %v2027_v17  ;;  %v1714_v17 = vor.u32 %v2290_v9, %v1713_v8  ;;  %v2049_v8 = vld [vmem:[#allocation7 + $0x348] sm:$0xf] }
  0x51   :  { %1144 = vmatpush.bf16.msrb.mxu3 %v2094_v36  ;;  %v254_v36 = vperm.slane %v251_v31, 1 }
  0x52   :  { %1106 = vmatpush.bf16.msrb.mxu0 %v1694_v26 }
  0x53   :  { %1119 = vmatpush.bf16.msrb.mxu1 %v1822_v28 }
  0x54   :  { %1132 = vmatpush.bf16.msrb.mxu2 %v1950_v44  ;;  %v1873_v44 = vld [vmem:[#allocation7 + $0x1e8] sm:$0xf] }
  0x55   :  { %1145 = vmatpush.bf16.msrb.mxu3 %v2078_v46  ;;  %v1874_v53 = vor.u32 %v2330_v45, %v1873_v44  ;;  %v1953_v44 = vld [vmem:[#allocation7 + $0x288] sm:$0xf]  ;;  %v2350_v45 = vld [vmem:[#allocation7 + $0x294] sm:$0xf0] }
  0x56   :  { %1107 = vmatpush.bf16.msrb.mxu0 %v1678_v37 }
  0x57   :  { %1120 = vmatpush.bf16.msrb.mxu1 %v1806_v40 }
  0x58   :  { %1133 = vmatpush.bf16.msrb.mxu2 %v1934_v55  ;;  %v2294_v55 = vld [vmem:[#allocation7 + $0xd4] sm:$0xf0] }
  0x59   :  { %1146 = vmatpush.bf16.msrb.mxu3 %v2062_v58  ;;  %v1730_v1 = vor.u32 %v2294_v55, %v1729_v54  ;;  %v2310_v54 = vld [vmem:[#allocation7 + $0x154] sm:$0xf0]  ;;  %v1954_v55 = vor.u32 %v2350_v45, %v1953_v44 }
  0x5a   :  { %1108 = vmatpush.bf16.msrb.mxu0 %v1662_v50 }
  0x5b   :  { %1121 = vmatpush.bf16.msrb.mxu1 %v1790_v52  ;;  %v256_v52 = vperm.slane %v251_v31, 3 }
  0x5c   :  { %1134 = vmatpush.bf16.msrb.mxu2 %v1918_v4  ;;  %v2129_v4 = vld [vmem:[#allocation7 + $0x3e8] sm:$0xf] }
  0x5d   :  { %1147 = vmatpush.bf16.msrb.mxu3 %v2046_v6  ;;  %v2130_v16 = vor.u32 %v2394_v7, %v2129_v4  ;;  %v2342_v7 = vld [vmem:[#allocation7 + $0x254] sm:$0xf0] }
  0x5e   :  { %1109 = vmatpush.bf16.msrb.mxu0 %v1646_v61  ;;  %v2326_v61 = vld [vmem:[#allocation7 + $0x1d4] sm:$0xf0] }
  0x5f   :  { %1122 = vmatpush.bf16.msrb.mxu1 %v1774_v0  ;;  %v1858_v6 = vor.u32 %v2326_v61, %v1857_v60 }
  0x60   :  { %1135 = vmatpush.bf16.msrb.mxu2 %v1902_v15 }
  0x61   :  { %1148 = vmatpush.bf16.msrb.mxu3 %v2030_v18  ;;  %v1985_v18 = vld [vmem:[#allocation7 + $0x2c8] sm:$0xf] }
  0x62   :  { %1110 = vmatpush.bf16.msrb.mxu0 %v1630_v10 }
  0x63   :  { %1123 = vmatpush.bf16.msrb.mxu1 %v1758_v12  ;;  %v2322_v12 = vld [vmem:[#allocation7 + $0x1b4] sm:$0xf0] }
  0x64   :  { %1136 = vmatpush.bf16.msrb.mxu2 %v1886_v21  ;;  %v1842_v23 = vor.u32 %v2322_v12, %v1841_v11  ;;  %v2374_v11 = vld [vmem:[#allocation7 + $0x354] sm:$0xf0]  ;;  %v1633_v12 = vld [vmem:[#allocation7 + $0x8] sm:$0xf] }
  0x65   :  { %1149 = vmatpush.bf16.msrb.mxu3 %v2014_v24  ;;  %v2390_v24 = vld [vmem:[#allocation7 + $0x3d4] sm:$0xf0] }
  0x66   :  { %v2114_v31 = vor.u32 %v2390_v24, %v2113_v20  ;;  %v2328_v20 = vld [vmem:[#allocation7 + $0x1ec] sm:$0xf]  ;;  %v1905_v24 = vld [vmem:[#allocation7 + $0x228] sm:$0xf] }
  0x9e   :  { %v132_v25 = vpop.f32.mrf.mxu0  ;;  %v145_v26 = vpop.f32.mrf.mxu1 }
  0xa5   :  { %v158_v27 = vpop.f32.mrf.mxu2 }
  0xa6   :  { %v134_v29 = vpop.f32.mrf.mxu0  ;;  %v147_v30 = vpop.f32.mrf.mxu1 }
  0xa7   :  { %v171_v28 = vpop.f32.mrf.mxu3  ;;  %v2318_v29 = vld [vmem:[#allocation7 + $0x194] sm:$0xf0]  ;;  %v1986_v30 = vor.u32 %v2358_v19, %v1985_v18  ;;  %v1747_v19 = vld [vmem:[#allocation7 + $0xf8] sm:$0xf0] }
  0xad   :  { %v160_v32 = vpop.f32.mrf.mxu2 }
  0xae   :  { %v208_v35 = vpop.f32.mrf.mxu0 }
  0xaf   :  { %v173_v34 = vpop.f32.mrf.mxu3  ;;  %v209_v37 = vadd.f32 %v208_v35, %v132_v25  ;;  %v221_v38 = vpop.f32.mrf.mxu1  ;;  %v1697_v25 = vld [vmem:[#allocation7 + $0x88] sm:$0xf] }
  0xb0   :  { %v222_v39 = vadd.f32 %v221_v38, %v145_v26  ;;  %v2286_v26 = vld [vmem:[#allocation7 + $0x94] sm:$0xf0]  ;;  %v1681_v38 = vld [vmem:[#allocation7 + $0x68] sm:$0xf] }
  0xb1   :  { %v261_v40 = vadd.f32 %v253_v33, %v209_v37  ;;  %v1698_v32 = vor.u32 %v2286_v26, %v1697_v25  ;;  %v1969_v33 = vld [vmem:[#allocation7 + $0x2a8] sm:$0xf]  ;;  %v2354_v34 = vld [vmem:[#allocation7 + $0x2b4] sm:$0xf0] }
  0xb2   :  { %v262_v43 = vadd.f32 %v254_v36, %v222_v39  ;;  %v2097_v36 = vld [vmem:[#allocation7 + $0x3a8] sm:$0xf]  ;;  %v2386_v37 = vld [vmem:[#allocation7 + $0x3b4] sm:$0xf0]  ;;  %v1970_v42 = vor.u32 %v2354_v34, %v1969_v33  ;;  %v1731_v34 = vld [vmem:[#allocation7 + $0xd8] sm:$0xf0] }
  0xb3   :  { %v265_v46 = vmax.f32 %v261_v40, 0.0  ;;  %v2282_v39 = vld [vmem:[#allocation7 + $0x74] sm:$0xf0]  ;;  %v1809_v40 = vld [vmem:[#allocation7 + $0x168] sm:$0xf] }
  0xb4   :  { %v266_v47 = vmax.f32 %v262_v43, 0.0  ;;  %v2098_v43 = vor.u32 %v2386_v37, %v2097_v36  ;;  %v2338_v25 = vld [vmem:[#allocation7 + $0x234] sm:$0xf0]  ;;  %v1859_v36 = vld [vmem:[#allocation7 + $0x1d8] sm:$0xf0] }
  0xb5   :  { %v2657_v50 = vpack.c.bf16 %v265_v46, %v265_v46  ;;  %v1682_v46 = vor.u32 %v2282_v39, %v1681_v38  ;;  %v1906_v33 = vor.u32 %v2338_v25, %v1905_v24  ;;  %v1889_v38 = vld [vmem:[#allocation7 + $0x208] sm:$0xf]  ;;  %v2334_v39 = vld [vmem:[#allocation7 + $0x214] sm:$0xf0]  ;;  %v2380_v24 = vld [vmem:[#allocation7 + $0x38c] sm:$0xf] }
  0xb6   :  { %v234_v51 = vpop.f32.mrf.mxu2  ;;  %v2659_v56 = vpack.c.bf16 %v266_v47, %v266_v47  ;;  %v210_v59 = vpop.f32.mrf.mxu0  ;;  %v1810_v47 = vor.u32 %v2314_v41, %v1809_v40  ;;  %v2017_v40 = vld [vmem:[#allocation7 + $0x308] sm:$0xf]  ;;  %v2366_v41 = vld [vmem:[#allocation7 + $0x314] sm:$0xf0]  ;;  %v2083_v25 = vld [vmem:[#allocation7 + $0x398] sm:$0xf0] }
  0xb7   :  { %v235_v57 = vadd.f32 %v234_v51, %v158_v27  ;;  %v247_v58 = vpop.f32.mrf.mxu3  ;;  %1059 = vmatmul.bf16.vlgmr.msra.gmra.mxu0 %v2657_v50  ;;  %v223_v63 = vpop.f32.mrf.mxu1  ;;  %v1665_v51 = vld [vmem:[#allocation7 + $0x48] sm:$0xf]  ;;  %v2346_v59 = vld [vmem:[#allocation7 + $0x274] sm:$0xf0] }
  0xb8   :  { %v248_v62 = vadd.f32 %v247_v58, %v171_v28  ;;  %1072 = vmatmul.bf16.vlgmr.msra.gmra.mxu1 %v2659_v56  ;;  %1155 = vmatpush.bf16.msra.mxu0 %v1746_v49  ;;  %v1825_v28 = vld [vmem:[#allocation7 + $0x188] sm:$0xf]  ;;  %v2382_v49 = vld [vmem:[#allocation7 + $0x394] sm:$0xf0] }
  0xb9   :  { %v263_v0 = vadd.f32 %v255_v48, %v235_v57  ;;  %1168 = vmatpush.bf16.msra.mxu1 %v1874_v53  ;;  %v1826_v35 = vor.u32 %v2318_v29, %v1825_v28  ;;  %v2081_v48 = vld [vmem:[#allocation7 + $0x388] sm:$0xf]  ;;  %v2378_v63 = vld [vmem:[#allocation7 + $0x374] sm:$0xf0] }
  0xba   :  { %v264_v5 = vadd.f32 %v256_v52, %v248_v62  ;;  %v2278_v52 = vld [vmem:[#allocation7 + $0x54] sm:$0xf0]  ;;  %v1793_v53 = vld [vmem:[#allocation7 + $0x148] sm:$0xf]  ;;  %v2082_v57 = vor.u32 %v2382_v49, %v2081_v48  ;;  %v2288_v48 = vld [vmem:[#allocation7 + $0xac] sm:$0xf]  ;;  %v1890_v49 = vor.u32 %v2334_v39, %v1889_v38 }
  0xbb   :  { %v267_v10 = vmax.f32 %v263_v0, 0.0  ;;  %v1937_v58 = vld [vmem:[#allocation7 + $0x268] sm:$0xf]  ;;  %v1666_v60 = vor.u32 %v2278_v52, %v1665_v51  ;;  %v1794_v61 = vor.u32 %v2310_v54, %v1793_v53  ;;  %v2370_v29 = vld [vmem:[#allocation7 + $0x334] sm:$0xf0]  ;;  %v2018_v54 = vor.u32 %v2366_v41, %v2017_v40 }
  0xbc   :  { %v268_v13 = vmax.f32 %v264_v5, 0.0  ;;  %1156 = vmatpush.bf16.msra.mxu0 %v1730_v1  ;;  %v2065_v62 = vld [vmem:[#allocation7 + $0x368] sm:$0xf]  ;;  %v2274_v1 = vld [vmem:[#allocation7 + $0x34] sm:$0xf0]  ;;  %v1938_v4 = vor.u32 %v2346_v59, %v1937_v58 }
  0xbd   :  { %v2663_v15 = vpack.c.bf16 %v267_v10, %v267_v10  ;;  %1169 = vmatpush.bf16.msra.mxu1 %v1858_v6  ;;  %v1649_v0 = vld [vmem:[#allocation7 + $0x28] sm:$0xf]  ;;  %v2066_v5 = vor.u32 %v2378_v63, %v2065_v62  ;;  %v1778_v10 = vor.u32 %v2306_v3, %v1777_v2  ;;  %v1715_v51 = vld [vmem:[#allocation7 + $0xb8] sm:$0xf0]  ;;  %v2320_v52 = vld [vmem:[#allocation7 + $0x1ac] sm:$0xf] }
  0xbe   :  { %v2665_v21 = vpack.c.bf16 %v268_v13, %v268_v13  ;;  %v236_v22 = vpop.f32.mrf.mxu2  ;;  %v1921_v6 = vld [vmem:[#allocation7 + $0x248] sm:$0xf]  ;;  %v1650_v9 = vor.u32 %v2274_v1, %v1649_v0  ;;  %v2270_v13 = vld [vmem:[#allocation7 + $0x14] sm:$0xf0]  ;;  %v1843_v53 = vld [vmem:[#allocation7 + $0x1b8] sm:$0xf0] }
  0xbf   :  { %v249_v27 = vpop.f32.mrf.mxu3  ;;  %1085 = vmatmul.bf16.vlgmr.msra.gmra.mxu2 %v2663_v15  ;;  %v1922_v18 = vor.u32 %v2342_v7, %v1921_v6  ;;  %v1875_v22 = vld [vmem:[#allocation7 + $0x1f8] sm:$0xf0]  ;;  %v1634_v26 = vor.u32 %v2270_v13, %v1633_v12  ;;  %v2033_v28 = vld [vmem:[#allocation7 + $0x328] sm:$0xf]  ;;  %v2356_v58 = vld [vmem:[#allocation7 + $0x2cc] sm:$0xf] }
  0xc0   :  { %1098 = vmatmul.bf16.vlgmr.msra.gmra.mxu3 %v2665_v21  ;;  %1181 = vmatpush.bf16.msra.mxu2 %v2002_v14  ;;  %v1761_v14 = vld [vmem:[#allocation7 + $0x108] sm:$0xf]  ;;  %v2034_v37 = vor.u32 %v2370_v29, %v2033_v28  ;;  %v1987_v59 = vld [vmem:[#allocation7 + $0x2d8] sm:$0xf0]  ;;  %v2388_v62 = vld [vmem:[#allocation7 + $0x3cc] sm:$0xf] }
  0xc1   :  { %1194 = vmatpush.bf16.msra.mxu3 %v2130_v16  ;;  %1157 = vmatpush.bf16.msra.mxu0 %v1714_v17  ;;  %v2302_v16 = vld [vmem:[#allocation7 + $0x114] sm:$0xf0]  ;;  %v2296_v17 = vld [vmem:[#allocation7 + $0xec] sm:$0xf]  ;;  %v2115_v63 = vld [vmem:[#allocation7 + $0x3d8] sm:$0xf0] }
  0xc2   :  { %1170 = vmatpush.bf16.msra.mxu1 %v1842_v23  ;;  %v2050_v23 = vor.u32 %v2374_v11, %v2049_v8  ;;  %v1762_v27 = vor.u32 %v2302_v16, %v1761_v14  ;;  %v2284_v0 = vld [vmem:[#allocation7 + $0x8c] sm:$0xf]  ;;  %v1699_v1 = vld [vmem:[#allocation7 + $0x98] sm:$0xf0] }
  0xc3   :  { %v2316_v2 = vld [vmem:[#allocation7 + $0x18c] sm:$0xf]  ;;  %v1827_v3 = vld [vmem:[#allocation7 + $0x198] sm:$0xf0]  ;;  %v1702_v8 = vor.u32 %v2284_v0, %v1699_v1 }
  0xc4   :  { %1182 = vmatpush.bf16.msra.mxu2 %v1986_v30  ;;  %v1750_v30 = vor.u32 %v2296_v17, %v1747_v19  ;;  %v2352_v6 = vld [vmem:[#allocation7 + $0x2ac] sm:$0xf]  ;;  %v1971_v7 = vld [vmem:[#allocation7 + $0x2b8] sm:$0xf0] }
  0xc5   :  { %1195 = vmatpush.bf16.msra.mxu3 %v2114_v31  ;;  %1158 = vmatpush.bf16.msra.mxu0 %v1698_v32  ;;  %v1878_v31 = vor.u32 %v2328_v20, %v1875_v22  ;;  %v2292_v32 = vld [vmem:[#allocation7 + $0xcc] sm:$0xf]  ;;  %v2099_v11 = vld [vmem:[#allocation7 + $0x3b8] sm:$0xf0]  ;;  %v1974_v17 = vor.u32 %v2352_v6, %v1971_v7  ;;  %v2401_v7 = vld [vmem:[#allocation8 + $0x30] sm:$0xff] }
  0xc6   :  { %1171 = vmatpush.bf16.msra.mxu1 %v1826_v35  ;;  %v2324_v35 = vld [vmem:[#allocation7 + $0x1cc] sm:$0xf]  ;;  %v1734_v44 = vor.u32 %v2292_v32, %v1731_v34  ;;  %v1683_v13 = vld [vmem:[#allocation7 + $0x78] sm:$0xf0] }
  0xc7   :  { %1111 = vmatmul.bf16.vlgmr.msrb.gmra.mxu0 %v2657_v50  ;;  %v1862_v45 = vor.u32 %v2324_v35, %v1859_v36  ;;  %v2280_v12 = vld [vmem:[#allocation7 + $0x6c] sm:$0xf]  ;;  %v1811_v16 = vld [vmem:[#allocation7 + $0x178] sm:$0xf0] }
  0xc8   :  { %1183 = vmatpush.bf16.msra.mxu2 %v1970_v42  ;;  %1124 = vmatmul.bf16.vlgmr.msrb.gmra.mxu1 %v2659_v56  ;;  %v2360_v42 = vld [vmem:[#allocation7 + $0x2ec] sm:$0xf]  ;;  %v1955_v20 = vld [vmem:[#allocation7 + $0x298] sm:$0xf0]  ;;  %v1686_v22 = vor.u32 %v2280_v12, %v1683_v13 }
  0xc9   :  { %1196 = vmatpush.bf16.msra.mxu3 %v2098_v43  ;;  %1159 = vmatpush.bf16.msra.mxu0 %v1682_v46  ;;  %v2003_v43 = vld [vmem:[#allocation7 + $0x2f8] sm:$0xf0]  ;;  %v2392_v46 = vld [vmem:[#allocation7 + $0x3ec] sm:$0xf] }
  0xca   :  { %1172 = vmatpush.bf16.msra.mxu1 %v1810_v47  ;;  %v2131_v47 = vld [vmem:[#allocation7 + $0x3f8] sm:$0xf0]  ;;  %v2312_v14 = vld [vmem:[#allocation7 + $0x16c] sm:$0xf] }
  0xcb   :  { %v2348_v19 = vld [vmem:[#allocation7 + $0x28c] sm:$0xf]  ;;  %v1795_v29 = vld [vmem:[#allocation7 + $0x158] sm:$0xf0] }
  0xcc   :  { %1184 = vmatpush.bf16.msra.mxu2 %v1954_v55  ;;  %v2006_v55 = vor.u32 %v2360_v42, %v2003_v43  ;;  %v2308_v28 = vld [vmem:[#allocation7 + $0x14c] sm:$0xf]  ;;  %v1651_v39 = vld [vmem:[#allocation7 + $0x38] sm:$0xf0] }
  0xcd   :  { %1197 = vmatpush.bf16.msra.mxu3 %v2082_v57  ;;  %1160 = vmatpush.bf16.msra.mxu0 %v1666_v60  ;;  %v2134_v57 = vor.u32 %v2392_v46, %v2131_v47  ;;  %v1718_v60 = vor.u32 %v2288_v48, %v1715_v51  ;;  %v2344_v32 = vld [vmem:[#allocation7 + $0x26c] sm:$0xf]  ;;  %v1798_v35 = vor.u32 %v2308_v28, %v1795_v29  ;;  %v1779_v41 = vld [vmem:[#allocation7 + $0x138] sm:$0xf0]  ;;  %v2415_v28 = vld [vmem:[#allocation8 + $0xa0] sm:$0xff] }
  0xce   :  { %1173 = vmatpush.bf16.msra.mxu1 %v1794_v61  ;;  %v1846_v61 = vor.u32 %v2320_v52, %v1843_v53  ;;  %v2376_v36 = vld [vmem:[#allocation7 + $0x36c] sm:$0xf]  ;;  %v1635_v52 = vld [vmem:[#allocation7 + $0x18] sm:$0xf0] }
  0xcf   :  { %1137 = vmatmul.bf16.vlgmr.msrb.gmra.mxu2 %v2663_v15  ;;  %v2272_v38 = vld [vmem:[#allocation7 + $0x2c] sm:$0xf]  ;;  %v2402_v0 = vld [vmem:[#allocation8 + $0x38] sm:$0xff] }
  0xd0   :  { %1150 = vmatmul.bf16.vlgmr.msrb.gmra.mxu3 %v2665_v21  ;;  %1185 = vmatpush.bf16.msra.mxu2 %v1938_v4  ;;  %v1990_v4 = vor.u32 %v2356_v58, %v1987_v59  ;;  %v2304_v40 = vld [vmem:[#allocation7 + $0x12c] sm:$0xf]  ;;  %v1654_v46 = vor.u32 %v2272_v38, %v1651_v39  ;;  %v1907_v59 = vld [vmem:[#allocation7 + $0x238] sm:$0xf0] }
  0xd1   :  { %1198 = vmatpush.bf16.msra.mxu3 %v2066_v5  ;;  %1161 = vmatpush.bf16.msra.mxu0 %v1650_v9  ;;  %v2118_v5 = vor.u32 %v2388_v62, %v2115_v63  ;;  %v1830_v9 = vor.u32 %v2316_v2, %v1827_v3  ;;  %v1782_v47 = vor.u32 %v2304_v40, %v1779_v41  ;;  %v2372_v48 = vld [vmem:[#allocation7 + $0x34c] sm:$0xf]  ;;  %v2035_v63 = vld [vmem:[#allocation7 + $0x338] sm:$0xf0] }
  0xd2   :  { %1174 = vmatpush.bf16.msra.mxu1 %v1778_v10  ;;  %v2384_v10 = vld [vmem:[#allocation7 + $0x3ac] sm:$0xf]  ;;  %v2019_v6 = vld [vmem:[#allocation7 + $0x318] sm:$0xf0] }
  0xd3   :  { %v2268_v51 = vld [vmem:[#allocation7 + $0xc] sm:$0xf]  ;;  %v2410_v12 = vld [vmem:[#allocation8 + $0x78] sm:$0xff] }
  0xd4   :  { %1186 = vmatpush.bf16.msra.mxu2 %v1922_v18  ;;  %v2102_v18 = vor.u32 %v2384_v10, %v2099_v11  ;;  %v2300_v53 = vld [vmem:[#allocation7 + $0x10c] sm:$0xf]  ;;  %v2399_v11 = vld [vmem:[#allocation8 + $0x20] sm:$0xff]  ;;  %v2398_v13 = vld [vmem:[#allocation8 + $0x18] sm:$0xff] }
  0xd5   :  { %1199 = vmatpush.bf16.msra.mxu3 %v2050_v23  ;;  %1162 = vmatpush.bf16.msra.mxu0 %v1634_v26  ;;  %v1814_v23 = vor.u32 %v2312_v14, %v1811_v16  ;;  %v2276_v26 = vld [vmem:[#allocation7 + $0x4c] sm:$0xf]  ;;  %v2397_v14 = vld [vmem:[#allocation8 + $0x10] sm:$0xff] }
  0xd6   :  { %1175 = vmatpush.bf16.msra.mxu1 %v1762_v27  ;;  %v1667_v27 = vld [vmem:[#allocation7 + $0x58] sm:$0xf0]  ;;  %v2336_v58 = vld [vmem:[#allocation7 + $0x22c] sm:$0xf] }
  0xd7   :  { %v1670_v34 = vor.u32 %v2276_v26, %v1667_v27  ;;  %v2368_v62 = vld [vmem:[#allocation7 + $0x32c] sm:$0xf]  ;;  %v1910_v1 = vor.u32 %v2336_v58, %v1907_v59  ;;  %v2403_v27 = vld [vmem:[#allocation8 + $0x40] sm:$0xff] }
  0xd8   :  { %1187 = vmatpush.bf16.msra.mxu2 %v1906_v33  ;;  %1163 = vmatmul.bf16.vlgmr.msra.gmra.mxu0 %v2657_v50  ;;  %v1939_v33 = vld [vmem:[#allocation7 + $0x278] sm:$0xf0]  ;;  %v2038_v2 = vor.u32 %v2368_v62, %v2035_v63  ;;  %v2332_v3 = vld [vmem:[#allocation7 + $0x20c] sm:$0xf] }
  0xd9   :  { %1207 = vmatpush.bf16.msrb.mxu0 %v1750_v30  ;;  %1200 = vmatpush.bf16.msra.mxu3 %v2034_v37  ;;  %v1958_v30 = vor.u32 %v2348_v19, %v1955_v20  ;;  %v2067_v37 = vld [vmem:[#allocation7 + $0x378] sm:$0xf0]  ;;  %v1942_v42 = vor.u32 %v2344_v32, %v1939_v33  ;;  %v2400_v10 = vld [vmem:[#allocation8 + $0x28] sm:$0xff]  ;;  %v2405_v19 = vld [vmem:[#allocation8 + $0x50] sm:$0xff] }
  0xda   :  { %1220 = vmatpush.bf16.msrb.mxu1 %v1878_v31  ;;  %v2086_v31 = vor.u32 %v2380_v24, %v2083_v25  ;;  %v2070_v43 = vor.u32 %v2376_v36, %v2067_v37  ;;  %v2408_v16 = vld [vmem:[#allocation8 + $0x68] sm:$0xff]  ;;  %v2417_v20 = vld [vmem:[#allocation8 + $0xb0] sm:$0xff] }
  0xdb   :  { %1176 = vmatmul.bf16.vlgmr.msra.gmra.mxu1 %v2659_v56  ;;  %v2684_v25 = vld [vmem:[%s2702_s6] sm:$0xf]  ;;  %v2412_v39 = vld [vmem:[#allocation8 + $0x88] sm:$0xff] }
  0xdc   :  { %1188 = vmatpush.bf16.msra.mxu2 %v1890_v49  ;;  %v2051_v49 = vld [vmem:[#allocation7 + $0x358] sm:$0xf0]  ;;  %v403_v29 = vperm.slane %v2684_v25, 0 }
  0xdd   :  { %1208 = vmatpush.bf16.msrb.mxu0 %v1734_v44  ;;  %1201 = vmatpush.bf16.msra.mxu3 %v2018_v54  ;;  %v2340_v44 = vld [vmem:[#allocation7 + $0x24c] sm:$0xf]  ;;  %v1763_v54 = vld [vmem:[#allocation7 + $0x118] sm:$0xf0] }
  0xde   :  { %1221 = vmatpush.bf16.msrb.mxu1 %v1862_v45  ;;  %v1923_v45 = vld [vmem:[#allocation7 + $0x258] sm:$0xf0] }
  0xdf   :  { %1189 = vmatmul.bf16.vlgmr.msra.gmra.mxu2 %v2663_v15 }
  0xe0   :  { %1233 = vmatpush.bf16.msrb.mxu2 %v2006_v55  ;;  %1202 = vmatmul.bf16.vlgmr.msra.gmra.mxu3 %v2665_v21  ;;  %v1926_v55 = vor.u32 %v2340_v44, %v1923_v45  ;;  %v2411_v44 = vld [vmem:[#allocation8 + $0x80] sm:$0xff]  ;;  %v2426_v45 = vld [vmem:[#allocation8 + $0xf8] sm:$0xff] }
  0xe1   :  { %1246 = vmatpush.bf16.msrb.mxu3 %v2134_v57  ;;  %1209 = vmatpush.bf16.msrb.mxu0 %v1718_v60  ;;  %v2054_v57 = vor.u32 %v2372_v48, %v2051_v49  ;;  %v1638_v60 = vor.u32 %v2268_v51, %v1635_v52  ;;  %v2425_v51 = vld [vmem:[#allocation8 + $0xf0] sm:$0xff] }
  0xe2   :  { %1222 = vmatpush.bf16.msrb.mxu1 %v1846_v61  ;;  %v1766_v61 = vor.u32 %v2300_v53, %v1763_v54 }
  0xe4   :  { %1234 = vmatpush.bf16.msrb.mxu2 %v1990_v4  ;;  %v1891_v4 = vld [vmem:[#allocation7 + $0x218] sm:$0xf0] }
  0xe5   :  { %1247 = vmatpush.bf16.msrb.mxu3 %v2118_v5  ;;  %1210 = vmatpush.bf16.msrb.mxu0 %v1702_v8  ;;  %v2364_v5 = vld [vmem:[#allocation7 + $0x30c] sm:$0xf]  ;;  %v1894_v8 = vor.u32 %v2332_v3, %v1891_v4  ;;  %v405_v4 = vperm.slane %v2684_v25, 2 }
  0xe6   :  { %1223 = vmatpush.bf16.msrb.mxu1 %v1830_v9  ;;  %v2022_v9 = vor.u32 %v2364_v5, %v2019_v6 }
  0xe8   :  { %1235 = vmatpush.bf16.msrb.mxu2 %v1974_v17  ;;  %v2395_v17 = vld [vmem:[#allocation8] sm:$0xff] }
  0xe9   :  { %1248 = vmatpush.bf16.msrb.mxu3 %v2102_v18  ;;  %1211 = vmatpush.bf16.msrb.mxu0 %v1686_v22  ;;  %v2407_v18 = vld [vmem:[#allocation8 + $0x60] sm:$0xff]  ;;  %v2404_v22 = vld [vmem:[#allocation8 + $0x48] sm:$0xff] }
  0xea   :  { %1224 = vmatpush.bf16.msrb.mxu1 %v1814_v23  ;;  %v2416_v23 = vld [vmem:[#allocation8 + $0xa8] sm:$0xff] }
  0xec   :  { %1236 = vmatpush.bf16.msrb.mxu2 %v1958_v30  ;;  %v2414_v30 = vld [vmem:[#allocation8 + $0x98] sm:$0xff] }
  0xed   :  { %1249 = vmatpush.bf16.msrb.mxu3 %v2086_v31  ;;  %1212 = vmatpush.bf16.msrb.mxu0 %v1670_v34  ;;  %v2413_v34 = vld [vmem:[#allocation8 + $0x90] sm:$0xff] }
  0xee   :  { %1225 = vmatpush.bf16.msrb.mxu1 %v1798_v35 }
  0xf0   :  { %1237 = vmatpush.bf16.msrb.mxu2 %v1942_v42 }
  0xf1   :  { %1250 = vmatpush.bf16.msrb.mxu3 %v2070_v43  ;;  %1213 = vmatpush.bf16.msrb.mxu0 %v1654_v46 }
  0xf2   :  { %1226 = vmatpush.bf16.msrb.mxu1 %v1782_v47  ;;  %v404_v47 = vperm.slane %v2684_v25, 1 }
  0xf4   :  { %1238 = vmatpush.bf16.msrb.mxu2 %v1926_v55  ;;  %v2424_v55 = vld [vmem:[#allocation8 + $0xe8] sm:$0xff] }
  0xf5   :  { %1251 = vmatpush.bf16.msrb.mxu3 %v2054_v57  ;;  %1214 = vmatpush.bf16.msrb.mxu0 %v1638_v60 }
  0xf6   :  { %1227 = vmatpush.bf16.msrb.mxu1 %v1766_v61  ;;  %v2423_v61 = vld [vmem:[#allocation8 + $0xe0] sm:$0xff] }
  0xf8   :  { %1239 = vmatpush.bf16.msrb.mxu2 %v1910_v1  ;;  %1215 = vmatmul.bf16.vlgmr.msrb.gmra.mxu0 %v2657_v50  ;;  %v2409_v50 = vld [vmem:[#allocation8 + $0x70] sm:$0xff] }
  0xf9   :  { %1527 = vmatpush.bf16.msra.mxu0 %v2402_v0  ;;  %1252 = vmatpush.bf16.msrb.mxu3 %v2038_v2  ;;  %v2422_v0 = vld [vmem:[#allocation8 + $0xd8] sm:$0xff] }
  0xfa   :  { %1228 = vmatmul.bf16.vlgmr.msrb.gmra.mxu1 %v2659_v56  ;;  %v2396_v56 = vld [vmem:[#allocation8 + $0x8] sm:$0xff] }
  0xfb   :  { %1540 = vmatpush.bf16.msra.mxu1 %v2410_v12 }
  0xfc   :  { %1240 = vmatpush.bf16.msrb.mxu2 %v1894_v8 }
  0xfd   :  { %1528 = vmatpush.bf16.msra.mxu0 %v2401_v7  ;;  %1253 = vmatpush.bf16.msrb.mxu3 %v2022_v9  ;;  %v2421_v7 = vld [vmem:[#allocation8 + $0xd0] sm:$0xff] }
  0xff   :  { %1241 = vmatmul.bf16.vlgmr.msrb.gmra.mxu2 %v2663_v15  ;;  %1541 = vmatpush.bf16.msra.mxu1 %v2409_v50  ;;  %v2406_v15 = vld [vmem:[#allocation8 + $0x58] sm:$0xff] }
 0x100   :  { %1254 = vmatmul.bf16.vlgmr.msrb.gmra.mxu3 %v2665_v21  ;;  %v2418_v21 = vld [vmem:[#allocation8 + $0xb8] sm:$0xff] }
 0x101   :  { %1529 = vmatpush.bf16.msra.mxu0 %v2400_v10  ;;  %1553 = vmatpush.bf16.msra.mxu2 %v2418_v21 }
 0x102   :  { %1566 = vmatpush.bf16.msra.mxu3 %v2426_v45 }
 0x103   :  { %1542 = vmatpush.bf16.msra.mxu1 %v2408_v16 }
 0x105   :  { %1530 = vmatpush.bf16.msra.mxu0 %v2399_v11  ;;  %1554 = vmatpush.bf16.msra.mxu2 %v2417_v20  ;;  %v2420_v11 = vld [vmem:[#allocation8 + $0xc8] sm:$0xff] }
 0x106   :  { %1567 = vmatpush.bf16.msra.mxu3 %v2425_v51 }
 0x107   :  { %1543 = vmatpush.bf16.msra.mxu1 %v2407_v18 }
 0x109   :  { %1531 = vmatpush.bf16.msra.mxu0 %v2398_v13  ;;  %1555 = vmatpush.bf16.msra.mxu2 %v2416_v23 }
 0x10a   :  { %1568 = vmatpush.bf16.msra.mxu3 %v2424_v55 }
 0x10b   :  { %1544 = vmatpush.bf16.msra.mxu1 %v2406_v15 }
 0x10d   :  { %1532 = vmatpush.bf16.msra.mxu0 %v2397_v14  ;;  %1556 = vmatpush.bf16.msra.mxu2 %v2415_v28 }
 0x10e   :  { %1569 = vmatpush.bf16.msra.mxu3 %v2423_v61 }
 0x10f   :  { %1545 = vmatpush.bf16.msra.mxu1 %v2405_v19 }
 0x111   :  { %1533 = vmatpush.bf16.msra.mxu0 %v2396_v56  ;;  %1557 = vmatpush.bf16.msra.mxu2 %v2414_v30  ;;  %v2419_v56 = vld [vmem:[#allocation8 + $0xc0] sm:$0xff] }
 0x112   :  { %1570 = vmatpush.bf16.msra.mxu3 %v2422_v0 }
 0x113   :  { %1546 = vmatpush.bf16.msra.mxu1 %v2404_v22  ;;  %v406_v22 = vperm.slane %v2684_v25, 3  ;;  %v2436_v25 = vld [vmem:[%s2704_s8] ss:$0 sm:$0xff] }
 0x115   :  { %1534 = vmatpush.bf16.msra.mxu0 %v2395_v17  ;;  %1558 = vmatpush.bf16.msra.mxu2 %v2413_v34 }
 0x116   :  { %1571 = vmatpush.bf16.msra.mxu3 %v2421_v7 }
 0x117   :  { %1547 = vmatpush.bf16.msra.mxu1 %v2403_v27 }
 0x119   :  { %1559 = vmatpush.bf16.msra.mxu2 %v2412_v39 }
 0x11a   :  { %1572 = vmatpush.bf16.msra.mxu3 %v2420_v11 }
 0x11d   :  { %1560 = vmatpush.bf16.msra.mxu2 %v2411_v44 }
 0x11e   :  { %1573 = vmatpush.bf16.msra.mxu3 %v2419_v56 }
 0x134   :  { %v1060_v24 = vpop.f32.mrf.mxu0 }
 0x135   :  { %v1073_v26 = vpop.f32.mrf.mxu1  ;;  %v1061_v31 = vadd.f32 %v1060_v24, %v403_v29 }
 0x137   :  { %v1074_v35 = vadd.f32 %v1073_v26, %v1061_v31 }
 0x13c   :  { %v1062_v32 = vpop.f32.mrf.mxu0 }
 0x13d   :  { %v1075_v33 = vpop.f32.mrf.mxu1 }
 0x142   :  { %v1086_v36 = vpop.f32.mrf.mxu2 }
 0x143   :  { %v1087_v37 = vadd.f32 %v1086_v36, %v1074_v35  ;;  %v1099_v38 = vpop.f32.mrf.mxu3 }
 0x144   :  { %v1112_v41 = vpop.f32.mrf.mxu0 }
 0x145   :  { %v1100_v40 = vadd.f32 %v1099_v38, %v1087_v37  ;;  %v1125_v42 = vpop.f32.mrf.mxu1  ;;  %v1113_v52 = vadd.f32 %v1112_v41, %v404_v47 }
 0x147   :  { %v1259_v43 = vmax.f32 %v1100_v40, 0.0  ;;  %v1126_v57 = vadd.f32 %v1125_v42, %v1113_v52 }
 0x149   :  { %v1263_v46 = vpack.c.bf16 %v1259_v43, %v1259_v43 }
 0x14a   :  { %v1088_v48 = vpop.f32.mrf.mxu2 }
 0x14b   :  { %v1101_v49 = vpop.f32.mrf.mxu3  ;;  %1535 = vmatmul.bf16.vlgmr.msra.gmra.mxu0 %v1263_v46 }
 0x14c   :  { %v1114_v53 = vpop.f32.mrf.mxu0 }
 0x14d   :  { %v1127_v54 = vpop.f32.mrf.mxu1 }
 0x152   :  { %v1138_v58 = vpop.f32.mrf.mxu2 }
 0x153   :  { %v1139_v59 = vadd.f32 %v1138_v58, %v1126_v57  ;;  %v1151_v60 = vpop.f32.mrf.mxu3 }
 0x155   :  { %v1152_v62 = vadd.f32 %v1151_v60, %v1139_v59  ;;  %v1164_v63 = vpop.f32.mrf.mxu0 }
 0x156   :  { %v1165_v8 = vadd.f32 %v1164_v63, %v405_v4 }
 0x157   :  { %v1260_v1 = vmax.f32 %v1152_v62, 0.0 }
 0x158   :  { %v1177_v2 = vpop.f32.mrf.mxu1 }
 0x159   :  { %v1264_v3 = vpack.c.bf16 %v1260_v1, %v1260_v1  ;;  %v1178_v12 = vadd.f32 %v1177_v2, %v1165_v8 }
 0x15a   :  { %v1140_v5 = vpop.f32.mrf.mxu2 }
 0x15b   :  { %v1153_v6 = vpop.f32.mrf.mxu3  ;;  %1548 = vmatmul.bf16.vlgmr.msra.gmra.mxu1 %v1264_v3 }
 0x15d   :  { %v1166_v9 = vpop.f32.mrf.mxu0 }
 0x160   :  { %v1179_v10 = vpop.f32.mrf.mxu1 }
 0x162   :  { %v1190_v13 = vpop.f32.mrf.mxu2 }
 0x163   :  { %v1203_v14 = vpop.f32.mrf.mxu3  ;;  %v1191_v50 = vadd.f32 %v1190_v13, %v1178_v12 }
 0x165   :  { %v1204_v16 = vadd.f32 %v1203_v14, %v1191_v50 }
 0x167   :  { %v1261_v17 = vmax.f32 %v1204_v16, 0.0 }
 0x169   :  { %v1265_v18 = vpack.c.bf16 %v1261_v17, %v1261_v17 }
 0x16a   :  { %v1192_v15 = vpop.f32.mrf.mxu2 }
 0x16b   :  { %v1205_v21 = vpop.f32.mrf.mxu3  ;;  %1561 = vmatmul.bf16.vlgmr.msra.gmra.mxu2 %v1265_v18 }
 0x175   :  { %v1216_v19 = vpop.f32.mrf.mxu0 }
 0x176   :  { %v1217_v23 = vadd.f32 %v1216_v19, %v406_v22 }
 0x177   :  { %v1229_v20 = vpop.f32.mrf.mxu1 }
 0x178   :  { %v1230_v27 = vadd.f32 %v1229_v20, %v1217_v23 }
 0x17d   :  { %v1218_v24 = vpop.f32.mrf.mxu0 }
 0x17f   :  { %v1231_v26 = vpop.f32.mrf.mxu1 }
 0x182   :  { %v1242_v28 = vpop.f32.mrf.mxu2 }
 0x183   :  { %v1243_v29 = vadd.f32 %v1242_v28, %v1230_v27  ;;  %v1255_v30 = vpop.f32.mrf.mxu3 }
 0x185   :  { %v1256_v31 = vadd.f32 %v1255_v30, %v1243_v29 }
 0x187   :  { %v1262_v32 = vmax.f32 %v1256_v31, 0.0 }
 0x189   :  { %v1266_v33 = vpack.c.bf16 %v1262_v32, %v1262_v32 }
 0x18a   :  { %v1244_v34 = vpop.f32.mrf.mxu2 }
 0x18b   :  { %v1257_v35 = vpop.f32.mrf.mxu3  ;;  %1574 = vmatmul.bf16.vlgmr.msra.gmra.mxu3 %v1266_v33 }
 0x1c8   :  { %v1536_v36 = vpop.f32.mrf.mxu0 }
 0x1c9   :  { %v1537_v42 = vadd.f32 %v2436_v25, %v1536_v36 }
 0x1d0   :  { %v1538_v37 = vpop.f32.mrf.mxu0 }
 0x1d8   :  { %v1549_v38 = vpop.f32.mrf.mxu1 }
 0x1d9   :  { %v1550_v43 = vadd.f32 %v1549_v38, %v1537_v42 }
 0x1e0   :  { %v1551_v39 = vpop.f32.mrf.mxu1 }
 0x1ee   :  { %v1562_v40 = vpop.f32.mrf.mxu2 }
 0x1ef   :  { %v1563_v44 = vadd.f32 %v1562_v40, %v1550_v43 }
 0x1f6   :  { %v1564_v41 = vpop.f32.mrf.mxu2 }
 0x20e   :  { %v1575_v45 = vpop.f32.mrf.mxu3 }
 0x20f   :  { %v1576_v46 = vadd.f32 %v1575_v45, %v1563_v44 }
 0x211   :  { %1579 = vst [vmem:[#allocation10] sm:$0xff] %v1576_v46 }
 0x212   :  { %1590 = dma.vmem_to_hbm [thread:$0]  %s1586_s15, 128, %s1588_s18, [#allocation4]  }
 0x216   :  { %v1577_v47 = vpop.f32.mrf.mxu3 }
 0x217   :  { %2563 = dma.done.wait [#allocation4], 128  }
 0x218   :  { %2564 = vsyncadd [#allocation4], 4294967168 }
 0x219   :  { %1595 = vsyncpa [#allocation3], 1 }
 0x21a   :  { %1596 = vsyncpa [#allocation6], 1 }
 0x21b   :  { %1597 = vsyncpa [#allocation9], 1 }
 0x21c   :  { %1598 = vsyncpa [#allocation4], 1 }

</bundles_post_ra>
